<compile_context>
chip_gen: v7x
topology: tpu7x:2x2x1
jax: 0.10.0
libtpu: 0.0.40
codegen_flags: <defaults>
</compile_context>

<pallas_src>
import jax
import jax.numpy as jnp
import numpy as np
from jax.experimental import pallas as pl
from jax.experimental.pallas import tpu as pltpu

ALPHA = 0.65
BETA = 0.35
MARGIN = 1.0
COS_EPS = 1e-8      # nn.CosineSimilarity default eps
FAIR_EPS = 1e-8     # eps in combined_metric denominator


def _round_up(x, m):
    return ((x + m - 1) // m) * m


def _vmem_capacity_bytes():
    """Physical per-core VMEM (generation aware); conservative v7x fallback."""
    try:
        info = pltpu.get_tpu_info()
        for name in ("vmem_capacity_bytes", "vmem_bytes", "vmem_size_bytes"):
            cap = getattr(info, name, None)
            if cap:
                return int(cap)
    except Exception:
        pass
    return 64 << 20  # v7x per-TensorCore VMEM (smallest of v5e/v6e/v7x)


def _choose_tile(b, d, itemsize, vmem_cap):
    """Pick the batch-tile row count.

    - multiple of the sublane pack (8 rows f32, 16 rows bf16) unless it is the
      whole batch (full-dim blocks are always legal),
    - per-input block sized so 2 inputs x 2 pipeline buffers sit well inside the
      physical VMEM of the current generation,
    - medium problems that would fit one block are split in two so both v7x
      TensorCores get work on the "parallel" grid axis.
    """
    row_mult = max(8, 32 // max(itemsize, 1))          # 8 (f32) / 16 (bf16) / 32 (i8)
    bytes_per_row = max(d * itemsize, 1)
    per_block_cap = max(row_mult * bytes_per_row, min(8 << 20, vmem_cap // 16))
    tb_cap = max(row_mult, (per_block_cap // bytes_per_row) // row_mult * row_mult)
    if b <= tb_cap:
        if 2 * b * bytes_per_row >= (1 << 20) and b >= 4 * row_mult:
            tb = _round_up((b + 1) // 2, row_mult)     # >=2 tiles for megacore
            if tb < b:
                return tb
        return b
    return tb_cap


def _build_kernel(b, tb, ragged):
    def kernel(r_ref, s_ref, pos_ref, dist_ref, rsum_ref, ssum_ref):
        # (TB, D) tiles; upcast in-register so bf16 inputs DMA at half the bytes.
        r = r_ref[...].astype(jnp.float32)
        s = s_ref[...].astype(jnp.float32)
        if ragged:
            # Ragged last tile: zero out-of-range rows so they contribute exactly
            # 0 to every reduction (replaces the old jnp.pad HBM copy).
            row = (jax.lax.broadcasted_iota(jnp.int32, (tb, 1), 0)
                   + pl.program_id(0) * tb)
            valid = row < b
            r = jnp.where(valid, r, 0.0)
            s = jnp.where(valid, s, 0.0)

        eps2 = jnp.float32(COS_EPS * COS_EPS)
        sumsq_r = jnp.sum(r * r, axis=1, keepdims=True)          # (TB, 1)
        sumsq_s = jnp.sum(s * s, axis=1, keepdims=True)          # (TB, 1)
        rs = jnp.sum(r * s, axis=1, keepdims=True)               # (TB, 1)
        inv_r = jax.lax.rsqrt(jnp.maximum(sumsq_r, eps2))        # (TB, 1)
        inv_s = jax.lax.rsqrt(jnp.maximum(sumsq_s, eps2))        # (TB, 1)

        # Diagonal (paired) cosine similarities.
        pos = rs * inv_r * inv_s                                 # (TB, 1)
        # ||r_i - s_i|| via the norm identity (no diff temporary); clamp >= 0
        # against catastrophic cancellation when r_i ~= s_i before the sqrt.
        dist = jnp.sqrt(jnp.maximum(sumsq_r + sumsq_s - 2.0 * rs, 0.0))

        pos_ref[...] = pos
        dist_ref[...] = dist
        # Per-tile partial column sums of the normalized embeddings; reduced
        # across tiles in glue to form the total cosine-matrix sum.
        rsum_ref[...] = jnp.sum(r * inv_r, axis=0, keepdims=True)[None]   # (1,1,D)
        ssum_ref[...] = jnp.sum(s * inv_s, axis=0, keepdims=True)[None]   # (1,1,D)
    return kernel


def fairness_aware_contrastive_loss(real_embeddings, synthetic_embeddings,
                                    alpha=ALPHA, beta=BETA, margin=MARGIN):
    b, d = real_embeddings.shape
    itemsize = jnp.dtype(real_embeddings.dtype).itemsize
    vmem_cap = _vmem_capacity_bytes()
    tb = _choose_tile(b, d, itemsize, vmem_cap)
    num_tiles = pl.cdiv(b, tb)
    ragged = (b % tb) != 0

    block_bytes = tb * d * itemsize
    vmem_needed = 4 * block_bytes + 4 * (2 * tb + 2 * d) * 4 + (2 << 20)
    vmem_limit = int(min(vmem_cap * 3 // 4, max(vmem_needed, 32 << 20)))

    # Deeper input buffering only where blocks are too small to hide DMA issue
    # latency behind compute (tiny-D / small-block corner).
    if block_bytes < (256 << 10) and num_tiles > 4:
        def in_spec():
            return pl.BlockSpec((tb, d), lambda i: (i, 0),
                                pipeline_mode=pl.Buffered(3))
    else:
        def in_spec():
            return pl.BlockSpec((tb, d), lambda i: (i, 0))

    pos, dist, rsums, ssums = pl.pallas_call(
        _build_kernel(b, tb, ragged),
        out_shape=(
            jax.ShapeDtypeStruct((b, 1), jnp.float32),             # diag cosine
            jax.ShapeDtypeStruct((b, 1), jnp.float32),             # euclidean dist
            jax.ShapeDtypeStruct((num_tiles, 1, d), jnp.float32),  # sum_i r_i/|r_i|
            jax.ShapeDtypeStruct((num_tiles, 1, d), jnp.float32),  # sum_j s_j/|s_j|
        ),
        grid=(num_tiles,),
        in_specs=[in_spec(), in_spec()],
        out_specs=(
            pl.BlockSpec((tb, 1), lambda i: (i, 0)),
            pl.BlockSpec((tb, 1), lambda i: (i, 0)),
            pl.BlockSpec((1, 1, d), lambda i: (i, 0, 0)),
            pl.BlockSpec((1, 1, d), lambda i: (i, 0, 0)),
        ),
        compiler_params=pltpu.CompilerParams(
            dimension_semantics=("parallel",),
            vmem_limit_bytes=vmem_limit),
    )(real_embeddings, synthetic_embeddings)

    pos = pos[:, 0]            # (B,)
    dist = dist[:, 0]          # (B,)

    # Cross-tile reduction (tiny: num_tiles x D) + total cosine-matrix sum.
    r_colsum = jnp.sum(rsums[:, 0, :], axis=0)    # (D,)
    s_colsum = jnp.sum(ssums[:, 0, :], axis=0)    # (D,)
    total = jnp.dot(r_colsum, s_colsum, precision=jax.lax.Precision.HIGHEST)
    pos_sum = jnp.sum(pos)
    negative_similarity = (total - pos_sum) / (b * (b - 1))

    # Contrastive term: mean(clamp(margin - pos + neg, min=0))
    contrastive_loss = jnp.mean(
        jnp.maximum(margin - pos + negative_similarity, 0.0))

    # Fairness term
    # TODO(synk): torch.acos is evaluated in glue (on a length-B vector) because
    #             Mosaic's lowering of acos is not guaranteed.
    angles = jnp.arccos(jnp.clip(pos, -1.0, 1.0))
    combined_metric = 2.0 * (dist * angles) / (dist + angles + FAIR_EPS)
    fairness_loss = jnp.mean(combined_metric)

    return beta * contrastive_loss + alpha * fairness_loss


def _reference_loss(r, s, alpha=ALPHA, beta=BETA, margin=MARGIN):
    """Pure numpy reference mirroring the PyTorch forward pass."""
    r = np.asarray(r, dtype=np.float64)
    s = np.asarray(s, dtype=np.float64)
    b = r.shape[0]
    rn = np.linalg.norm(r, axis=1)
    sn = np.linalg.norm(s, axis=1)
    cos_mat = (r @ s.T) / np.maximum(rn[:, None] * sn[None, :], COS_EPS)
    pos = np.diag(cos_mat)
    neg = (cos_mat.sum() - pos.sum()) / (b * (b - 1))
    contrastive = np.mean(np.maximum(margin - pos + neg, 0.0))
    dist = np.linalg.norm(r - s, axis=1)
    angles = np.arccos(np.clip(pos, -1.0, 1.0))
    combined = 2.0 * (dist * angles) / (dist + angles + FAIR_EPS)
    fairness = np.mean(combined)
    return beta * contrastive + alpha * fairness


if __name__ == "__main__":
    B, D = 8, 32
    key = jax.random.PRNGKey(0)
    k_real, k_syn = jax.random.split(key)
    real = jax.random.normal(k_real, (B, D), dtype=jnp.float32)
    syn = jax.random.normal(k_syn, (B, D), dtype=jnp.float32)

    loss = fairness_aware_contrastive_loss(real, syn)
    loss = jax.block_until_ready(loss)

    ref = _reference_loss(np.array(real), np.array(syn))
    if not np.allclose(np.array(loss), ref, rtol=1e-4, atol=1e-5):
        raise AssertionError(f"mismatch: pallas={float(loss)} ref={float(ref)}")

    print("KERNEL_OK")
</pallas_src>

<mosaic_0001>
module attributes {stable_mosaic.version = 11 : i64} {
  func.func @kernel(%arg0: i32, %arg1: memref<8x32xf32, #tpu.memory_space<vmem>>, %arg2: memref<8x32xf32, #tpu.memory_space<vmem>>, %arg3: memref<8x1xf32, #tpu.memory_space<vmem>>, %arg4: memref<8x1xf32, #tpu.memory_space<vmem>>, %arg5: memref<1x1x32xf32, #tpu.memory_space<vmem>>, %arg6: memref<1x1x32xf32, #tpu.memory_space<vmem>>) attributes {dimension_semantics = [#tpu.dimension_semantics<parallel>], iteration_bounds = array<i64: 1>, scalar_prefetch = 0 : i64, scratch_operands = 0 : i64, tpu.core_type = #tpu.core_type<tc>, window_params = [{transform_indices = @transform_0, window_bounds = array<i64: 8, 32>}, {transform_indices = @transform_1, window_bounds = array<i64: 8, 32>}, {transform_indices = @transform_2, window_bounds = array<i64: 8, 1>}, {transform_indices = @transform_3, window_bounds = array<i64: 8, 1>}, {transform_indices = @transform_4, window_bounds = array<i64: 1, 1, 32>}, {transform_indices = @transform_5, window_bounds = array<i64: 1, 1, 32>}]} {
    %c0 = arith.constant 0 : index
    %c0_0 = arith.constant 0 : index
    %0 = vector.load %arg1[%c0, %c0_0] : memref<8x32xf32, #tpu.memory_space<vmem>>, vector<8x32xf32>
    %c0_1 = arith.constant 0 : index
    %c0_2 = arith.constant 0 : index
    %1 = vector.load %arg2[%c0_1, %c0_2] : memref<8x32xf32, #tpu.memory_space<vmem>>, vector<8x32xf32>
    %2 = arith.mulf %0, %0 : vector<8x32xf32>
    %cst = arith.constant dense<0.000000e+00> : vector<8xf32>
    %3 = vector.multi_reduction <add>, %2, %cst [1] : vector<8x32xf32> to vector<8xf32>
    %4 = vector.shape_cast %3 : vector<8xf32> to vector<8x1xf32>
    %5 = arith.mulf %1, %1 : vector<8x32xf32>
    %cst_3 = arith.constant dense<0.000000e+00> : vector<8xf32>
    %6 = vector.multi_reduction <add>, %5, %cst_3 [1] : vector<8x32xf32> to vector<8xf32>
    %7 = vector.shape_cast %6 : vector<8xf32> to vector<8x1xf32>
    %8 = arith.mulf %0, %1 : vector<8x32xf32>
    %cst_4 = arith.constant dense<0.000000e+00> : vector<8xf32>
    %9 = vector.multi_reduction <add>, %8, %cst_4 [1] : vector<8x32xf32> to vector<8xf32>
    %10 = vector.shape_cast %9 : vector<8xf32> to vector<8x1xf32>
    %cst_5 = arith.constant 1.000000e-16 : f32
    %11 = vector.broadcast %cst_5 : f32 to vector<8x1xf32>
    %12 = arith.maximumf %4, %11 : vector<8x1xf32>
    %13 = math.rsqrt %12 : vector<8x1xf32>
    %cst_6 = arith.constant 1.000000e-16 : f32
    %14 = vector.broadcast %cst_6 : f32 to vector<8x1xf32>
    %15 = arith.maximumf %7, %14 : vector<8x1xf32>
    %16 = math.rsqrt %15 : vector<8x1xf32>
    %17 = arith.mulf %10, %13 : vector<8x1xf32>
    %18 = arith.mulf %17, %16 : vector<8x1xf32>
    %19 = arith.addf %4, %7 : vector<8x1xf32>
    %cst_7 = arith.constant 2.000000e+00 : f32
    %20 = vector.broadcast %cst_7 : f32 to vector<8x1xf32>
    %21 = arith.mulf %20, %10 : vector<8x1xf32>
    %22 = arith.subf %19, %21 : vector<8x1xf32>
    %cst_8 = arith.constant 0.000000e+00 : f32
    %23 = vector.broadcast %cst_8 : f32 to vector<8x1xf32>
    %24 = arith.maximumf %22, %23 : vector<8x1xf32>
    %25 = math.sqrt %24 : vector<8x1xf32>
    %c0_9 = arith.constant 0 : index
    %c0_10 = arith.constant 0 : index
    %26 = vector.load %arg3[%c0_9, %c0_10] : memref<8x1xf32, #tpu.memory_space<vmem>>, vector<8x1xf32>
    tpu.vector_store %arg3[%c0_9, %c0_10], %18 {strides = array<i32>} : memref<8x1xf32, #tpu.memory_space<vmem>>, vector<8x1xf32>,
    %c0_11 = arith.constant 0 : index
    %c0_12 = arith.constant 0 : index
    %27 = vector.load %arg4[%c0_11, %c0_12] : memref<8x1xf32, #tpu.memory_space<vmem>>, vector<8x1xf32>
    tpu.vector_store %arg4[%c0_11, %c0_12], %25 {strides = array<i32>} : memref<8x1xf32, #tpu.memory_space<vmem>>, vector<8x1xf32>,
    %28 = vector.broadcast %13 : vector<8x1xf32> to vector<8x32xf32>
    %29 = arith.mulf %0, %28 : vector<8x32xf32>
    %cst_13 = arith.constant dense<0.000000e+00> : vector<32xf32>
    %30 = vector.multi_reduction <add>, %29, %cst_13 [0] : vector<8x32xf32> to vector<32xf32>
    %31 = vector.shape_cast %30 : vector<32xf32> to vector<1x32xf32>
    %32 = vector.shape_cast %31 : vector<1x32xf32> to vector<1x1x32xf32>
    %c0_14 = arith.constant 0 : index
    %c0_15 = arith.constant 0 : index
    %c0_16 = arith.constant 0 : index
    %33 = vector.load %arg5[%c0_14, %c0_15, %c0_16] : memref<1x1x32xf32, #tpu.memory_space<vmem>>, vector<1x1x32xf32>
    tpu.vector_store %arg5[%c0_14, %c0_15, %c0_16], %32 {strides = array<i32>} : memref<1x1x32xf32, #tpu.memory_space<vmem>>, vector<1x1x32xf32>,
    %34 = vector.broadcast %16 : vector<8x1xf32> to vector<8x32xf32>
    %35 = arith.mulf %1, %34 : vector<8x32xf32>
    %cst_17 = arith.constant dense<0.000000e+00> : vector<32xf32>
    %36 = vector.multi_reduction <add>, %35, %cst_17 [0] : vector<8x32xf32> to vector<32xf32>
    %37 = vector.shape_cast %36 : vector<32xf32> to vector<1x32xf32>
    %38 = vector.shape_cast %37 : vector<1x32xf32> to vector<1x1x32xf32>
    %c0_18 = arith.constant 0 : index
    %c0_19 = arith.constant 0 : index
    %c0_20 = arith.constant 0 : index
    %39 = vector.load %arg6[%c0_18, %c0_19, %c0_20] : memref<1x1x32xf32, #tpu.memory_space<vmem>>, vector<1x1x32xf32>
    tpu.vector_store %arg6[%c0_18, %c0_19, %c0_20], %38 {strides = array<i32>} : memref<1x1x32xf32, #tpu.memory_space<vmem>>, vector<1x1x32xf32>,
    return
  }
  func.func @transform_0(%arg0: i32) -> (i32, i32) {
    %c0_i32 = arith.constant 0 : i32
    %c0_i32_0 = arith.constant 0 : i32
    return %arg0, %c0_i32 : i32, i32
  }
  func.func @transform_1(%arg0: i32) -> (i32, i32) {
    %c0_i32 = arith.constant 0 : i32
    %c0_i32_0 = arith.constant 0 : i32
    return %arg0, %c0_i32 : i32, i32
  }
  func.func @transform_2(%arg0: i32) -> (i32, i32) {
    %c0_i32 = arith.constant 0 : i32
    %c0_i32_0 = arith.constant 0 : i32
    return %arg0, %c0_i32 : i32, i32
  }
  func.func @transform_3(%arg0: i32) -> (i32, i32) {
    %c0_i32 = arith.constant 0 : i32
    %c0_i32_0 = arith.constant 0 : i32
    return %arg0, %c0_i32 : i32, i32
  }
  func.func @transform_4(%arg0: i32) -> (i32, i32, i32) {
    %c0_i32 = arith.constant 0 : i32
    %c0_i32_0 = arith.constant 0 : i32
    %c0_i32_1 = arith.constant 0 : i32
    return %arg0, %c0_i32, %c0_i32_0 : i32, i32, i32
  }
  func.func @transform_5(%arg0: i32) -> (i32, i32, i32) {
    %c0_i32 = arith.constant 0 : i32
    %c0_i32_0 = arith.constant 0 : i32
    %c0_i32_1 = arith.constant 0 : i32
    return %arg0, %c0_i32, %c0_i32_0 : i32, i32, i32
  }
}

</mosaic_0001>

<bundles_post_ra>
// kernel: tpu_custom_call.1
= control target key start
LH: loop header
LB: loop body
LE: loop exit
PB: predicated region body
PF: predicated region fallthrough
CT: control target
= control target key end

     0   :  { %11 = vsyncpa [#allocation3], 0  ;;  %s336_s0 = inlined_call_operand.hbm [shape: f32[8,32], index: 0, kind: input, shape index: {}]   ;;  %s337_s1 = inlined_call_operand.hbm [shape: f32[8,32], index: 1, kind: input, shape index: {}]   ;;  %s338_s2 = inlined_call_operand.vmem [shape: f32[8,1], index: 2, kind: output, shape index: {0}]   ;;  %s339_s3 = inlined_call_operand.vmem [shape: f32[8,1], index: 3, kind: output, shape index: {1}]   ;;  %s340_s4 = inlined_call_operand.hbm [shape: f32[1,1,32], index: 4, kind: output, shape index: {2}]   ;;  %s341_s5 = inlined_call_operand.hbm [shape: f32[1,1,32], index: 5, kind: output, shape index: {3}]  }
   0x1   :  { %12 = vsyncpa [#allocation6], 0 }
   0x2   :  { %13 = vsyncpa [#allocation4], 0 }
   0x3   :  { %14 = vsyncpa [#allocation9], 0  ;;  %s239_s18 = smov [#allocation2]   ;;  %s240_s20 = smov [#allocation5]  }
   0x4   :  { %s21_s19 = sshll.u32 %s239_s18, 4  ;;  %s31_s21 = sshll.u32 %s240_s20, 4  ;;  %s22_s19 = int_to_ptr.vmem [resolvable:$true] %s21_s19  ;;  %s32_s21 = int_to_ptr.vmem [resolvable:$true] %s31_s21 }
   0x5   :  { %s143_s24 = scalar_lea.hbm %s336_s0, 128 }
   0x6   :  { %p144_p0 = scmp.ne.s32.totalorder %s336_s0, %s143_s24  ;;  %p147_p1 = scmp.lt.u32.totalorder %s143_s24, %s336_s0 }
   0x8   :  { %p149_p2 = pnand %p147_p1, %p144_p0 }
   0xa   :  { %152 = shalt.err (!%p149_p2)
}
   0xb   :  { %s153_s29 = scalar_lea.vmem %s22_s19, 128  ;;  %p158_p4 = scmp.lt.s32.totalorder %s22_s19, %s22_s19 }
   0xc   :  { %p154_p3 = scmp.ne.s32.totalorder %s22_s19, %s153_s29  ;;  %p159_p5 = scmp.lt.s32.totalorder %s153_s29, %s153_s29 }
   0xe   :  { %p160_p6 = por %p159_p5, %p158_p4 }
  0x10   :  { %p161_p7 = pnand %p160_p6, %p154_p3 }
  0x12   :  { %164 = shalt.err (!%p161_p7)
}
  0x13   :  { %24 = dma.hbm_to_vmem [thread:$0]  %s336_s0, 128, %s22_s19, [#allocation3]  }
  0x14   :  { %s165_s9 = scalar_lea.hbm %s337_s1, 128 }
  0x15   :  { %p166_p8 = scmp.ne.s32.totalorder %s337_s1, %s165_s9  ;;  %p169_p9 = scmp.lt.u32.totalorder %s165_s9, %s337_s1 }
  0x17   :  { %p171_p10 = pnand %p169_p9, %p166_p8 }
  0x19   :  { %174 = shalt.err (!%p171_p10)
}
  0x1a   :  { %s175_s14 = scalar_lea.vmem %s32_s21, 128  ;;  %p180_p12 = scmp.lt.s32.totalorder %s32_s21, %s32_s21 }
  0x1b   :  { %p176_p11 = scmp.ne.s32.totalorder %s32_s21, %s175_s14  ;;  %p181_p13 = scmp.lt.s32.totalorder %s175_s14, %s175_s14 }
  0x1d   :  { %p182_p0 = por %p181_p13, %p180_p12 }
  0x1f   :  { %p183_p1 = pnand %p182_p0, %p176_p11 }
  0x21   :  { %186 = shalt.err (!%p183_p1)
}
  0x22   :  { %34 = dma.hbm_to_vmem [thread:$0]  %s337_s1, 128, %s32_s21, [#allocation6]  }
  0x23   :  { %231 = dma.done.wait [#allocation3], 128  }
  0x24   :  { %232 = vsyncadd [#allocation3], 4294967168 }
  0x25   :  { %233 = dma.done.wait [#allocation6], 128  }
  0x26   :  { %234 = vsyncadd [#allocation6], 4294967168  ;;  %v41_v0 = vld [vmem:[#allocation2] sm:$0xff]  ;;  %vm44_vm0 = vcmask 261120   ;;  %v42_v1 = vld [vmem:[#allocation5] sm:$0xff]  ;;  %vm73_vm1 = vcmask 7168  }
  0x27   :  { %v43_v2 = vmul.f32 %v41_v0, %v41_v0  ;;  %v52_v3 = vmul.f32 %v42_v1, %v41_v0  ;;  %v48_v4 = vmul.f32 %v42_v1, %v42_v1  ;;  %s241_s17 = smov [#allocation7]   ;;  %vm84_vm4 = vcmask 253952   ;;  %s242_s20 = smov [#allocation8]  }
  0x28   :  { %s105_s18 = sshll.u32 %s241_s17, 4  ;;  %s115_s21 = sshll.u32 %s242_s20, 4  ;;  %s106_s18 = int_to_ptr.vmem [resolvable:$true] %s105_s18  ;;  %s116_s21 = int_to_ptr.vmem [resolvable:$true] %s115_s21 }
  0x29   :  { %v45_v5 = vsel %vm44_vm0, %v43_v2, 0.0  ;;  %v53_v6 = vsel %vm44_vm0, %v52_v3, 0.0  ;;  %v49_v7 = vsel %vm44_vm0, %v48_v4, 0.0  ;;  %s187_s22 = scalar_lea.vmem %s106_s18, 16  ;;  %s191_s23 = scalar_lea.vmem %s106_s18, 32 }
  0x2a   :  { %46 = vadd.xlane.f32.xlu0 %v45_v5  ;;  %54 = vadd.xlane.f32.xlu1 %v53_v6  ;;  %p188_p2 = scmp.ne.s32.totalorder %s106_s18, %s187_s22  ;;  %p192_p3 = scmp.lt.s32.totalorder %s106_s18, %s106_s18 }
  0x2b   :  { %p193_p4 = scmp.lt.s32.totalorder %s191_s23, %s187_s22 }
  0x2d   :  { %p194_p5 = por %p193_p4, %p192_p3 }
  0x2e   :  { %50 = vadd.xlane.f32.xlu0 %v49_v7 }
  0x2f   :  { %p195_p6 = pnand %p194_p5, %p188_p2 }
  0xb7   :  { %v47_v8 = vpop.xlane.xlu0 %46  ;;  %v55_v9 = vpop.xlane.xlu1 %54 }
  0xb8   :  { %v56_v10 = vmax.f32 %v47_v8, 1e-16  ;;  %v63_v11 = vmul.f32 2.0, %v55_v9 }
  0xba   :  { %137 = vrsqrt.f32 %v56_v10 }
  0xbb   :  { %v51_v12 = vpop.xlane.xlu0 %50 }
  0xbc   :  { %v58_v13 = vmax.f32 %v51_v12, 1e-16  ;;  %v62_v14 = vadd.f32 %v51_v12, %v47_v8 }
  0xbe   :  { %139 = vrsqrt.f32 %v58_v13  ;;  %v64_v15 = vsub.f32 %v62_v14, %v63_v11 }
  0xc0   :  { %v65_v16 = vmax.f32 %v64_v15, 0.0 }
  0xc2   :  { %141 = vrsqrt.f32 %v65_v16  ;;  %vm68_vm2 = vcmp.eq.f32.partialorder %v65_v16, inf  ;;  %v71_v31 = vand.u32 2147483648, %v65_v16  ;;  %vm70_vm3 = vcmp.eq.f32.partialorder %v65_v16, 0.0 }
  0xc4   :  { %v138_v17 = vpop.eup %137 }
  0xc5   :  { %v76_v18 = vmul.f32 %v138_v17, %v41_v0  ;;  %v60_v19 = vmul.f32 %v138_v17, %v55_v9 }
  0xc7   :  { %v77_v20 = vsel %vm44_vm0, %v76_v18, 0.0 }
  0xc8   :  { %v140_v21 = vpop.eup %139  ;;  %v78_v22 = vrot.slane %v77_v20, 4 }
  0xc9   :  { %v61_v23 = vmul.f32 %v140_v21, %v60_v19  ;;  %v86_v24 = vmul.f32 %v140_v21, %v42_v1 }
  0xca   :  { %v79_v25 = vadd.f32 %v78_v22, %v77_v20 }
  0xcb   :  { %74 = vst.msk [vmem:[%s338_s2] sm:$0xff] %vm73_vm1, %v61_v23  ;;  %v87_v26 = vsel %vm44_vm0, %v86_v24, 0.0 }
  0xcc   :  { %v142_v27 = vpop.eup %141  ;;  %v80_v28 = vrot.slane %v79_v25, 2  ;;  %v88_v29 = vrot.slane %v87_v26, 4 }
  0xcd   :  { %v67_v30 = vmul.f32 %v142_v27, %v65_v16 }
  0xce   :  { %v81_v32 = vadd.f32 %v80_v28, %v79_v25  ;;  %v89_v33 = vadd.f32 %v88_v29, %v87_v26 }
  0xcf   :  { %v69_v34 = vsel %vm68_vm2, %v65_v16, %v67_v30 }
  0xd0   :  { %v72_v35 = vsel %vm70_vm3, %v71_v31, %v69_v34  ;;  %v82_v36 = vrot.slane %v81_v32, 1  ;;  %v90_v37 = vrot.slane %v89_v33, 2 }
  0xd1   :  { %75 = vst.msk [vmem:[%s339_s3] sm:$0xff] %vm73_vm1, %v72_v35 }
  0xd2   :  { %v83_v38 = vadd.f32 %v82_v36, %v81_v32  ;;  %v91_v39 = vadd.f32 %v90_v37, %v89_v33 }
  0xd4   :  { %85 = vst.msk [vmem:[#allocation7] sm:$0x1] %vm84_vm4, %v83_v38  ;;  %v92_v40 = vrot.slane %v91_v39, 1 }
  0xd5   :  { %198 = shalt.err (!%p195_p6)
}
  0xd6   :  { %s199_s3 = scalar_lea.hbm %s340_s4, 16 }
  0xd7   :  { %p200_p7 = scmp.ne.s32.totalorder %s340_s4, %s199_s3  ;;  %p203_p8 = scmp.lt.u32.totalorder %s199_s3, %s340_s4 }
  0xd9   :  { %p205_p9 = pnand %p203_p8, %p200_p7 }
  0xdb   :  { %208 = shalt.err (!%p205_p9)
}
  0xdc   :  { %108 = dma.vmem_to_hbm [thread:$0]  %s106_s18, 16, %s340_s4, [#allocation4]   ;;  %v93_v41 = vadd.f32 %v92_v40, %v91_v39 }
  0xdd   :  { %s209_s7 = scalar_lea.vmem %s116_s21, 16  ;;  %s213_s8 = scalar_lea.vmem %s116_s21, 32 }
  0xde   :  { %94 = vst.msk [vmem:[#allocation8] sm:$0x1] %vm84_vm4, %v93_v41  ;;  %p210_p10 = scmp.ne.s32.totalorder %s116_s21, %s209_s7  ;;  %p214_p11 = scmp.lt.s32.totalorder %s116_s21, %s116_s21 }
  0xdf   :  { %p215_p12 = scmp.lt.s32.totalorder %s213_s8, %s209_s7 }
  0xe1   :  { %p216_p13 = por %p215_p12, %p214_p11 }
  0xe3   :  { %p217_p0 = pnand %p216_p13, %p210_p10 }
  0xe5   :  { %220 = shalt.err (!%p217_p0)
}
  0xe6   :  { %s221_s11 = scalar_lea.hbm %s341_s5, 16 }
  0xe7   :  { %p222_p1 = scmp.ne.s32.totalorder %s341_s5, %s221_s11  ;;  %p225_p2 = scmp.lt.u32.totalorder %s221_s11, %s341_s5 }
  0xe9   :  { %p227_p3 = pnand %p225_p2, %p222_p1 }
  0xeb   :  { %230 = shalt.err (!%p227_p3)
}
  0xec   :  { %118 = dma.vmem_to_hbm [thread:$0]  %s116_s21, 16, %s341_s5, [#allocation9]  }
  0xed   :  { %235 = dma.done.wait [#allocation4], 16  }
  0xee   :  { %236 = vsyncadd [#allocation4], 4294967280 }
  0xef   :  { %237 = dma.done.wait [#allocation9], 16  }
  0xf0   :  { %238 = vsyncadd [#allocation9], 4294967280 }
  0xf1   :  { %129 = vsyncpa [#allocation3], 1 }
  0xf2   :  { %130 = vsyncpa [#allocation6], 1 }
  0xf3   :  { %131 = vsyncpa [#allocation4], 1 }
  0xf4   :  { %132 = vsyncpa [#allocation9], 1 }

</bundles_post_ra>
